<compile_context>
chip_gen: v7x
topology: tpu7x:2x2x1
jax: 0.10.0
libtpu: 0.0.40
codegen_flags: <defaults>
</compile_context>

<pallas_src>
import jax
import jax.numpy as jnp
from jax.experimental import pallas as pl
from jax.experimental.pallas import tpu as pltpu


def _round_up(x, n):
    return ((x + n - 1) // n) * n


def _pick_col_tile(dp, target, unit=128):
    """Largest multiple of `unit` that divides `dp` and is <= target
    (dp is already a multiple of `unit`)."""
    best = unit
    t = unit
    limit = min(dp, max(target, unit))
    while t <= limit:
        if dp % t == 0:
            best = t
        t += unit
    return best


def dyn_tanh_kernel(x_ref, xcol_ref, wg_ref, wb_ref, bg_ref, bb_ref, o_ref):
    # x_ref:    (tm, Dp)  matmul LHS, input dtype (bf16/f32)
    # xcol_ref: (tm, tn)  column window of x for the elementwise affine
    # wg/wb:    (Dp, tn)  column tiles of the split projection weight
    # bg/bb:    (1, tn)   f32 bias tiles
    # o_ref:    (tm, tn)
    x = x_ref[...]
    gamma = jnp.dot(x, wg_ref[...], preferred_element_type=jnp.float32) + bg_ref[...]
    beta = jnp.dot(x, wb_ref[...], preferred_element_type=jnp.float32) + bb_ref[...]
    xc = xcol_ref[...].astype(jnp.float32)
    o_ref[...] = jnp.tanh(gamma * xc + beta).astype(o_ref.dtype)


def dyn_tanh_norm(x, w_t, b, *, tm=256, tn=512):
    """DynTanhNorm forward.

    x:   (..., D)  activations (f32 or bf16)
    w_t: (D, 2D)   transposed PyTorch Linear weight
    b:   (2D,)     Linear bias
    """
    orig_shape = x.shape
    d = orig_shape[-1]
    x2 = x.reshape(-1, d)
    m = x2.shape[0]

    # Split the fused projection into gamma / beta halves (PyTorch chunk order).
    wg = w_t[:, :d]
    wb = w_t[:, d:]
    bg = b[:d].astype(jnp.float32).reshape(1, d)
    bb = b[d:].astype(jnp.float32).reshape(1, d)

    # Lane-dense feature dim; row tile no larger than the (8-rounded) row count.
    dp = _round_up(d, 128)
    tm = min(tm, _round_up(m, 8))
    mp = _round_up(m, tm)
    tn = _pick_col_tile(dp, tn)

    if dp != d:
        pad_d = dp - d
        x2 = jnp.pad(x2, ((0, 0), (0, pad_d)))
        wg = jnp.pad(wg, ((0, pad_d), (0, pad_d)))
        wb = jnp.pad(wb, ((0, pad_d), (0, pad_d)))
        bg = jnp.pad(bg, ((0, 0), (0, pad_d)))
        bb = jnp.pad(bb, ((0, 0), (0, pad_d)))
    if mp != m:
        x2 = jnp.pad(x2, ((0, mp - m), (0, 0)))

    grid = (mp // tm, dp // tn)  # rows outer, output columns inner (fastest)

    x_bytes = x2.dtype.itemsize
    w_bytes = wg.dtype.itemsize
    # Double-buffered VMEM footprint of all pipelined operands (+ headroom).
    vmem_need = 2 * (tm * dp * x_bytes          # x matmul block
                     + tm * tn * x_bytes        # x column block
                     + 2 * dp * tn * w_bytes    # Wg + Wb tiles
                     + 2 * tn * 4               # bias tiles
                     + tm * tn * x_bytes)       # output tile
    vmem_limit = int(min(64 * 1024 * 1024, max(2 * vmem_need, 16 * 1024 * 1024)))

    cost = pl.CostEstimate(
        flops=4 * mp * dp * dp + 3 * mp * dp,
        transcendentals=mp * dp,
        bytes_accessed=int(2 * mp * dp * x_bytes                # x (both views)
                           + grid[0] * 2 * dp * dp * w_bytes    # weights per row tile
                           + grid[0] * 2 * dp * 4               # biases per row tile
                           + mp * dp * x_bytes))                # output

    out = pl.pallas_call(
        dyn_tanh_kernel,
        out_shape=jax.ShapeDtypeStruct((mp, dp), x.dtype),
        grid_spec=pltpu.PrefetchScalarGridSpec(
            num_scalar_prefetch=0,
            grid=grid,
            in_specs=[
                pl.BlockSpec((tm, dp), lambda i, j: (i, 0)),   # x (MXU LHS)
                pl.BlockSpec((tm, tn), lambda i, j: (i, j)),   # x column tile
                pl.BlockSpec((dp, tn), lambda i, j: (0, j)),   # Wg tile
                pl.BlockSpec((dp, tn), lambda i, j: (0, j)),   # Wb tile
                pl.BlockSpec((1, tn), lambda i, j: (0, j)),    # bg tile
                pl.BlockSpec((1, tn), lambda i, j: (0, j)),    # bb tile
            ],
            out_specs=pl.BlockSpec((tm, tn), lambda i, j: (i, j)),
        ),
        compiler_params=pltpu.CompilerParams(
            dimension_semantics=("parallel", "parallel"),
            vmem_limit_bytes=vmem_limit),
        cost_estimate=cost,
    )(x2, x2, wg, wb, bg, bb)

    return out[:m, :d].reshape(orig_shape)


if __name__ == "__main__":
    # Small shapes consistent with the module: batch=2, seq=8, embed_dim=32.
    B, S, D = 2, 8, 32
    key = jax.random.PRNGKey(0)
    kx, kw, kb = jax.random.split(key, 3)

    x = jax.random.normal(kx, (B, S, D), dtype=jnp.float32)

    # PyTorch-style Linear(D, 2D) init: weight (out, in), uniform +/- 1/sqrt(D).
    bound = 1.0 / (D ** 0.5)
    w = jax.random.uniform(kw, (2 * D, D), minval=-bound, maxval=bound,
                           dtype=jnp.float32)        # PyTorch weight (out, in)
    b = jax.random.uniform(kb, (2 * D,), minval=-bound, maxval=bound,
                           dtype=jnp.float32)
    w_t = w.T                                        # (D, 2D) for the kernel

    # f32 path.
    out = jax.block_until_ready(dyn_tanh_norm(x, w_t, b))

    # Plain-JAX reference.
    gb_ref = x @ w.T + b
    gamma_ref, beta_ref = gb_ref[..., :D], gb_ref[..., D:]
    ref = jnp.tanh(gamma_ref * x + beta_ref)
    assert out.shape == (B, S, D)
    assert jnp.allclose(out, ref, atol=1e-5, rtol=1e-5), "f32 mismatch vs reference"

    # bf16 MXU-operand path (f32 accumulation + f32 affine/tanh tail in-kernel).
    out_bf16 = jax.block_until_ready(
        dyn_tanh_norm(x.astype(jnp.bfloat16), w_t.astype(jnp.bfloat16), b))
    assert out_bf16.shape == (B, S, D) and out_bf16.dtype == jnp.bfloat16
    assert float(jnp.max(jnp.abs(out_bf16.astype(jnp.float32) - ref))) < 0.1, \
        "bf16 mismatch vs reference"

    print("KERNEL_OK")
</pallas_src>

<mosaic_0001>
module attributes {stable_mosaic.version = 11 : i64} {
  func.func @dyn_tanh_kernel(%arg0: i32, %arg1: i32, %arg2: memref<16x128xf32, #tpu.memory_space<vmem>>, %arg3: memref<16x128xf32, #tpu.memory_space<vmem>>, %arg4: memref<128x128xf32, #tpu.memory_space<vmem>>, %arg5: memref<128x128xf32, #tpu.memory_space<vmem>>, %arg6: memref<1x128xf32, #tpu.memory_space<vmem>>, %arg7: memref<1x128xf32, #tpu.memory_space<vmem>>, %arg8: memref<16x128xf32, #tpu.memory_space<vmem>>) attributes {dimension_semantics = [#tpu.dimension_semantics<parallel>, #tpu.dimension_semantics<parallel>], iteration_bounds = array<i64: 1, 1>, scalar_prefetch = 0 : i64, scratch_operands = 0 : i64, tpu.core_type = #tpu.core_type<tc>, window_params = [{transform_indices = @transform_0, window_bounds = array<i64: 16, 128>}, {transform_indices = @transform_1, window_bounds = array<i64: 16, 128>}, {transform_indices = @transform_2, window_bounds = array<i64: 128, 128>}, {transform_indices = @transform_3, window_bounds = array<i64: 128, 128>}, {transform_indices = @transform_4, window_bounds = array<i64: 1, 128>}, {transform_indices = @transform_5, window_bounds = array<i64: 1, 128>}, {transform_indices = @transform_6, window_bounds = array<i64: 16, 128>}]} {
    %c0 = arith.constant 0 : index
    %c0_0 = arith.constant 0 : index
    %0 = vector.load %arg2[%c0, %c0_0] : memref<16x128xf32, #tpu.memory_space<vmem>>, vector<16x128xf32>
    %c0_1 = arith.constant 0 : index
    %c0_2 = arith.constant 0 : index
    %1 = vector.load %arg4[%c0_1, %c0_2] : memref<128x128xf32, #tpu.memory_space<vmem>>, vector<128x128xf32>
    %cst = arith.constant dense<0.000000e+00> : vector<16x128xf32>
    %2 = tpu.matmul %0, %1, %cst {dimension_numbers = #tpu.dot_dimension_numbers<[1], [0], [0], [1], [0, 0, 1, 1], [], []>} : vector<16x128xf32>, vector<128x128xf32>, vector<16x128xf32> -> vector<16x128xf32>
    %c0_3 = arith.constant 0 : index
    %c0_4 = arith.constant 0 : index
    %3 = vector.load %arg6[%c0_3, %c0_4] : memref<1x128xf32, #tpu.memory_space<vmem>>, vector<1x128xf32>
    %4 = vector.broadcast %3 : vector<1x128xf32> to vector<16x128xf32>
    %5 = arith.addf %2, %4 : vector<16x128xf32>
    %c0_5 = arith.constant 0 : index
    %c0_6 = arith.constant 0 : index
    %6 = vector.load %arg5[%c0_5, %c0_6] : memref<128x128xf32, #tpu.memory_space<vmem>>, vector<128x128xf32>
    %cst_7 = arith.constant dense<0.000000e+00> : vector<16x128xf32>
    %7 = tpu.matmul %0, %6, %cst_7 {dimension_numbers = #tpu.dot_dimension_numbers<[1], [0], [0], [1], [0, 0, 1, 1], [], []>} : vector<16x128xf32>, vector<128x128xf32>, vector<16x128xf32> -> vector<16x128xf32>
    %c0_8 = arith.constant 0 : index
    %c0_9 = arith.constant 0 : index
    %8 = vector.load %arg7[%c0_8, %c0_9] : memref<1x128xf32, #tpu.memory_space<vmem>>, vector<1x128xf32>
    %9 = vector.broadcast %8 : vector<1x128xf32> to vector<16x128xf32>
    %10 = arith.addf %7, %9 : vector<16x128xf32>
    %c0_10 = arith.constant 0 : index
    %c0_11 = arith.constant 0 : index
    %11 = vector.load %arg3[%c0_10, %c0_11] : memref<16x128xf32, #tpu.memory_space<vmem>>, vector<16x128xf32>
    %12 = arith.mulf %5, %11 : vector<16x128xf32>
    %13 = arith.addf %12, %10 : vector<16x128xf32>
    %14 = math.tanh %13 : vector<16x128xf32>
    %c0_12 = arith.constant 0 : index
    %c0_13 = arith.constant 0 : index
    %15 = vector.load %arg8[%c0_12, %c0_13] : memref<16x128xf32, #tpu.memory_space<vmem>>, vector<16x128xf32>
    tpu.vector_store %arg8[%c0_12, %c0_13], %14 {strides = array<i32>} : memref<16x128xf32, #tpu.memory_space<vmem>>, vector<16x128xf32>,
    return
  }
  func.func @transform_0(%arg0: i32, %arg1: i32) -> (i32, i32) {
    %c0_i32 = arith.constant 0 : i32
    %c0_i32_0 = arith.constant 0 : i32
    return %arg0, %c0_i32 : i32, i32
  }
  func.func @transform_1(%arg0: i32, %arg1: i32) -> (i32, i32) {
    %c0_i32 = arith.constant 0 : i32
    return %arg0, %arg1 : i32, i32
  }
  func.func @transform_2(%arg0: i32, %arg1: i32) -> (i32, i32) {
    %c0_i32 = arith.constant 0 : i32
    %c0_i32_0 = arith.constant 0 : i32
    return %c0_i32, %arg1 : i32, i32
  }
  func.func @transform_3(%arg0: i32, %arg1: i32) -> (i32, i32) {
    %c0_i32 = arith.constant 0 : i32
    %c0_i32_0 = arith.constant 0 : i32
    return %c0_i32, %arg1 : i32, i32
  }
  func.func @transform_4(%arg0: i32, %arg1: i32) -> (i32, i32) {
    %c0_i32 = arith.constant 0 : i32
    %c0_i32_0 = arith.constant 0 : i32
    return %c0_i32, %arg1 : i32, i32
  }
  func.func @transform_5(%arg0: i32, %arg1: i32) -> (i32, i32) {
    %c0_i32 = arith.constant 0 : i32
    %c0_i32_0 = arith.constant 0 : i32
    return %c0_i32, %arg1 : i32, i32
  }
  func.func @transform_6(%arg0: i32, %arg1: i32) -> (i32, i32) {
    %c0_i32 = arith.constant 0 : i32
    return %arg0, %arg1 : i32, i32
  }
}

</mosaic_0001>

<bundles_post_ra>
// kernel: tpu_custom_call.1
= control target key start
LH: loop header
LB: loop body
LE: loop exit
PB: predicated region body
PF: predicated region fallthrough
CT: control target
= control target key end

     0   :  { %11 = vsyncpa [#allocation3], 0  ;;  %s744_s0 = inlined_call_operand.hbm [shape: f32[16,128], index: 0, kind: input, shape index: {}]   ;;  %s745_s1 = inlined_call_operand.hbm [shape: f32[16,128], index: 1, kind: input, shape index: {}]   ;;  %s746_s2 = inlined_call_operand.hbm [shape: f32[128,128], index: 2, kind: input, shape index: {}]   ;;  %s747_s3 = inlined_call_operand.hbm [shape: f32[128,128], index: 3, kind: input, shape index: {}]   ;;  %s748_s4 = inlined_call_operand.vmem [shape: f32[1,128], index: 4, kind: input, shape index: {}]   ;;  %s749_s5 = inlined_call_operand.vmem [shape: f32[1,128], index: 5, kind: input, shape index: {}]   ;;  %s750_s6 = inlined_call_operand.hbm [shape: f32[16,128], index: 6, kind: output, shape index: {}]  }
   0x1   :  { %12 = vsyncpa [#allocation6], 0 }
   0x2   :  { %13 = vsyncpa [#allocation9], 0 }
   0x3   :  { %14 = vsyncpa [#allocation4], 0  ;;  %s607_s21 = smov [#allocation5]   ;;  %s608_s23 = smov [#allocation2]  }
   0x4   :  { %s32_s22 = sshll.u32 %s607_s21, 4  ;;  %s20_s24 = sshll.u32 %s608_s23, 4  ;;  %s33_s22 = int_to_ptr.vmem [resolvable:$true] %s32_s22  ;;  %s649_s24 = int_to_ptr.vmem [resolvable:$true] %s20_s24 }
   0x5   :  { %s489_s27 = scalar_lea.hbm %s745_s1, 256 }
   0x6   :  { %p490_p0 = scmp.ne.s32.totalorder %s745_s1, %s489_s27  ;;  %p493_p1 = scmp.lt.u32.totalorder %s489_s27, %s745_s1 }
   0x8   :  { %p495_p2 = pnand %p493_p1, %p490_p0 }
   0xa   :  { %498 = shalt.err (!%p495_p2)
}
   0xb   :  { %s499_s8 = scalar_lea.vmem %s33_s22, 256  ;;  %p504_p4 = scmp.lt.s32.totalorder %s33_s22, %s33_s22 }
   0xc   :  { %p500_p3 = scmp.ne.s32.totalorder %s33_s22, %s499_s8  ;;  %p505_p5 = scmp.lt.s32.totalorder %s499_s8, %s499_s8 }
   0xe   :  { %p506_p6 = por %p505_p5, %p504_p4 }
  0x10   :  { %p507_p7 = pnand %p506_p6, %p500_p3 }
  0x12   :  { %510 = shalt.err (!%p507_p7)
}
  0x13   :  { %s609_s9 = smov 128   ;;  %s610_s10 = smov 8  }
  0x14   :  { %38 = dma.hbm_to_vmem [thread:$0]  %s745_s1, 256, %s33_s22, [#allocation6], %s609_s9, %s609_s9, %s610_s10  }
  0x15   :  { %s511_s15 = scalar_lea.hbm %s744_s0, 256 }
  0x16   :  { %p512_p8 = scmp.ne.s32.totalorder %s744_s0, %s511_s15  ;;  %p515_p9 = scmp.lt.u32.totalorder %s511_s15, %s744_s0 }
  0x18   :  { %p517_p10 = pnand %p515_p9, %p512_p8 }
  0x1a   :  { %520 = shalt.err (!%p517_p10)
}
  0x1b   :  { %s521_s20 = scalar_lea.vmem %s649_s24, 256  ;;  %p526_p12 = scmp.lt.s32.totalorder %s649_s24, %s649_s24 }
  0x1c   :  { %p522_p11 = scmp.ne.s32.totalorder %s649_s24, %s521_s20  ;;  %p527_p13 = scmp.lt.s32.totalorder %s521_s20, %s521_s20 }
  0x1e   :  { %p528_p0 = por %p527_p13, %p526_p12 }
  0x20   :  { %p529_p1 = pnand %p528_p0, %p522_p11 }
  0x22   :  { %532 = shalt.err (!%p529_p1)
}
  0x23   :  { %26 = dma.hbm_to_vmem [thread:$0]  %s744_s0, 256, %s649_s24, [#allocation3], %s609_s9, %s609_s9, %s610_s10  }
  0x24   :  { %s611_s22 = smov [#allocation7]   ;;  %s612_s25 = smov [#allocation8]  }
  0x25   :  { %s44_s23 = sshll.u32 %s611_s22, 4  ;;  %s56_s26 = sshll.u32 %s612_s25, 4  ;;  %s45_s23 = int_to_ptr.vmem [resolvable:$true] %s44_s23  ;;  %s686_s26 = int_to_ptr.vmem [resolvable:$true] %s56_s26 }
  0x26   :  { %s533_s29 = scalar_lea.hbm %s746_s2, 2048 }
  0x27   :  { %p534_p2 = scmp.ne.s32.totalorder %s746_s2, %s533_s29  ;;  %p537_p3 = scmp.lt.u32.totalorder %s533_s29, %s746_s2 }
  0x29   :  { %p539_p4 = pnand %p537_p3, %p534_p2 }
  0x2b   :  { %542 = shalt.err (!%p539_p4)
}
  0x2c   :  { %s543_s0 = scalar_lea.vmem %s45_s23, 2048  ;;  %p548_p6 = scmp.lt.s32.totalorder %s45_s23, %s45_s23 }
  0x2d   :  { %p544_p5 = scmp.ne.s32.totalorder %s45_s23, %s543_s0  ;;  %p549_p7 = scmp.lt.s32.totalorder %s543_s0, %s543_s0 }
  0x2f   :  { %p550_p8 = por %p549_p7, %p548_p6 }
  0x31   :  { %p551_p9 = pnand %p550_p8, %p544_p5 }
  0x33   :  { %554 = shalt.err (!%p551_p9)
}
  0x34   :  { %50 = dma.hbm_to_vmem [thread:$0]  %s746_s2, 2048, %s45_s23, [#allocation6], %s609_s9, %s609_s9, %s610_s10  }
  0x35   :  { %s555_s15 = scalar_lea.hbm %s747_s3, 2048 }
  0x36   :  { %p556_p10 = scmp.ne.s32.totalorder %s747_s3, %s555_s15  ;;  %p559_p11 = scmp.lt.u32.totalorder %s555_s15, %s747_s3 }
  0x38   :  { %p561_p12 = pnand %p559_p11, %p556_p10 }
  0x3a   :  { %564 = shalt.err (!%p561_p12)
}
  0x3b   :  { %s565_s20 = scalar_lea.vmem %s686_s26, 2048  ;;  %p570_p0 = scmp.lt.s32.totalorder %s686_s26, %s686_s26 }
  0x3c   :  { %p566_p13 = scmp.ne.s32.totalorder %s686_s26, %s565_s20  ;;  %p571_p1 = scmp.lt.s32.totalorder %s565_s20, %s565_s20 }
  0x3e   :  { %p572_p2 = por %p571_p1, %p570_p0 }
  0x40   :  { %p573_p3 = pnand %p572_p2, %p566_p13 }
  0x42   :  { %576 = shalt.err (!%p573_p3)
}
  0x43   :  { %62 = dma.hbm_to_vmem [thread:$0]  %s747_s3, 2048, %s686_s26, [#allocation9], %s609_s9, %s609_s9, %s610_s10  }
  0x44   :  { %599 = dma.done.wait [#allocation3], 256  }
  0x45   :  { %600 = vsyncadd [#allocation3], 4294967040 }
  0x46   :  { %601 = dma.done.wait [#allocation6], 2304  }
  0x47   :  { %602 = vsyncadd [#allocation6], 4294964992 }
  0x48   :  { %603 = dma.done.wait [#allocation9], 2048  }
  0x49   :  { %604 = vsyncadd [#allocation9], 4294965248  ;;  %v81_v0 = vld [vmem:[#allocation7] sm:$0xff]  ;;  %v82_v1 = vld [vmem:[#allocation7 + $0x8] sm:$0xff] }
  0x4a   :  { %v179_v2 = vld [vmem:[#allocation8] sm:$0xff]  ;;  %v414_v3 = vpack.c.bf16 %v82_v1, %v81_v0  ;;  %v180_v4 = vld [vmem:[#allocation8 + $0x8] sm:$0xff]  ;;  %v83_v5 = vld [vmem:[#allocation7 + $0x10] sm:$0xff] }
  0x4b   :  { %v84_v6 = vld [vmem:[#allocation7 + $0x18] sm:$0xff]  ;;  %v446_v7 = vpack.c.bf16 %v180_v4, %v179_v2  ;;  %v181_v9 = vld [vmem:[#allocation8 + $0x10] sm:$0xff]  ;;  %v85_v11 = vld [vmem:[#allocation7 + $0x20] sm:$0xff] }
  0x4c   :  { %v418_v8 = vpack.c.bf16 %v84_v6, %v83_v5  ;;  %v182_v10 = vld [vmem:[#allocation8 + $0x18] sm:$0xff]  ;;  %415 = vmatprep.subr.bf16.mxu0 %v414_v3  ;;  %v86_v13 = vld [vmem:[#allocation7 + $0x28] sm:$0xff]  ;;  %v183_v14 = vld [vmem:[#allocation8 + $0x20] sm:$0xff] }
  0x4d   :  { %v450_v12 = vpack.c.bf16 %v182_v10, %v181_v9  ;;  %v184_v15 = vld [vmem:[#allocation8 + $0x28] sm:$0xff]  ;;  %417 = vmatpush3.bf16.msra.mxu0 %v414_v3  ;;  %447 = vmatprep.subr.bf16.mxu1 %v446_v7  ;;  %v422_v16 = vpack.c.bf16 %v86_v13, %v85_v11  ;;  %v87_v18 = vld [vmem:[#allocation7 + $0x30] sm:$0xff]  ;;  %v88_v19 = vld [vmem:[#allocation7 + $0x38] sm:$0xff] }
  0x4e   :  { %449 = vmatpush3.bf16.msra.mxu1 %v446_v7  ;;  %419 = vmatprep.subr.bf16.mxu0 %v418_v8  ;;  %v454_v17 = vpack.c.bf16 %v184_v15, %v183_v14  ;;  %v185_v20 = vld [vmem:[#allocation8 + $0x30] sm:$0xff]  ;;  %v186_v21 = vld [vmem:[#allocation8 + $0x38] sm:$0xff]  ;;  %v426_v22 = vpack.c.bf16 %v88_v19, %v87_v18  ;;  %v89_v24 = vld [vmem:[#allocation7 + $0x40] sm:$0xff] }
  0x4f   :  { %451 = vmatprep.subr.bf16.mxu1 %v450_v12  ;;  %v458_v23 = vpack.c.bf16 %v186_v21, %v185_v20  ;;  %v90_v25 = vld [vmem:[#allocation7 + $0x48] sm:$0xff]  ;;  %v79_v26 = vld [vmem:[#allocation2] sm:$0xff]  ;;  %v91_v31 = vld [vmem:[#allocation7 + $0x50] sm:$0xff] }
  0x50   :  { %v187_v27 = vld [vmem:[#allocation8 + $0x40] sm:$0xff]  ;;  %v188_v28 = vld [vmem:[#allocation8 + $0x48] sm:$0xff]  ;;  %376 = vmatprep.mubr.f32.mxu0 %v79_v26  ;;  %411 = vmatprep.mubr.f32.mxu1 %v79_v26  ;;  %v430_v29 = vpack.c.bf16 %v90_v25, %v89_v24  ;;  %v92_v32 = vld [vmem:[#allocation7 + $0x58] sm:$0xff] }
  0x51   :  { %421 = vmatpush3.bf16.msra.mxu0 %v418_v8  ;;  %v462_v30 = vpack.c.bf16 %v188_v28, %v187_v27  ;;  %v189_v33 = vld [vmem:[#allocation8 + $0x50] sm:$0xff]  ;;  %v190_v34 = vld [vmem:[#allocation8 + $0x58] sm:$0xff]  ;;  %v434_v35 = vpack.c.bf16 %v92_v32, %v91_v31  ;;  %v93_v37 = vld [vmem:[#allocation7 + $0x60] sm:$0xff] }
  0x52   :  { %453 = vmatpush3.bf16.msra.mxu1 %v450_v12  ;;  %423 = vmatprep.subr.bf16.mxu0 %v422_v16  ;;  %v466_v36 = vpack.c.bf16 %v190_v34, %v189_v33  ;;  %v94_v38 = vld [vmem:[#allocation7 + $0x68] sm:$0xff]  ;;  %v191_v39 = vld [vmem:[#allocation8 + $0x60] sm:$0xff]  ;;  %v95_v43 = vld [vmem:[#allocation7 + $0x70] sm:$0xff] }
  0x53   :  { %455 = vmatprep.subr.bf16.mxu1 %v454_v17  ;;  %v192_v40 = vld [vmem:[#allocation8 + $0x68] sm:$0xff]  ;;  %v438_v41 = vpack.c.bf16 %v94_v38, %v93_v37  ;;  %v96_v44 = vld [vmem:[#allocation7 + $0x78] sm:$0xff]  ;;  %v193_v45 = vld [vmem:[#allocation8 + $0x70] sm:$0xff] }
  0x54   :  { %v470_v42 = vpack.c.bf16 %v192_v40, %v191_v39  ;;  %v194_v46 = vld [vmem:[#allocation8 + $0x78] sm:$0xff]  ;;  %v442_v47 = vpack.c.bf16 %v96_v44, %v95_v43  ;;  %v80_v49 = vld [vmem:[#allocation2 + $0x8] sm:$0xff]  ;;  %v306_v50 = vld [vmem:[%s748_s4] ss:$0 sm:$0xff]  ;;  %s613_s4 = smov [#allocation10]  }
  0x55   :  { %425 = vmatpush3.bf16.msra.mxu0 %v422_v16  ;;  %v474_v48 = vpack.c.bf16 %v194_v46, %v193_v45  ;;  %v307_v51 = vld [vmem:[%s749_s5] ss:$0 sm:$0xff]  ;;  %v278_v53 = vld [vmem:[#allocation5 + $0x8] sm:$0xff]  ;;  %v277_v56 = vld [vmem:[#allocation5] sm:$0xff]  ;;  %s292_s25 = sshll.u32 %s613_s4, 4  ;;  %s293_s25 = int_to_ptr.vmem [resolvable:$true] %s292_s25 }
  0x56   :  { %457 = vmatpush3.bf16.msra.mxu1 %v454_v17  ;;  %427 = vmatprep.subr.bf16.mxu0 %v426_v22  ;;  %s577_s5 = scalar_lea.vmem %s293_s25, 256  ;;  %p582_p5 = scmp.lt.s32.totalorder %s293_s25, %s293_s25 }
  0x57   :  { %459 = vmatprep.subr.bf16.mxu1 %v458_v23  ;;  %p578_p4 = scmp.ne.s32.totalorder %s293_s25, %s577_s5  ;;  %p583_p6 = scmp.lt.s32.totalorder %s577_s5, %s577_s5 }
  0x59   :  { %429 = vmatpush3.bf16.msra.mxu0 %v426_v22  ;;  %p584_p7 = por %p583_p6, %p582_p5 }
  0x5a   :  { %461 = vmatpush3.bf16.msra.mxu1 %v458_v23  ;;  %431 = vmatprep.subr.bf16.mxu0 %v430_v29 }
  0x5b   :  { %463 = vmatprep.subr.bf16.mxu1 %v462_v30  ;;  %p585_p8 = pnand %p584_p7, %p578_p4 }
  0x5d   :  { %433 = vmatpush3.bf16.msra.mxu0 %v430_v29 }
  0x5e   :  { %465 = vmatpush3.bf16.msra.mxu1 %v462_v30  ;;  %435 = vmatprep.subr.bf16.mxu0 %v434_v35 }
  0x5f   :  { %467 = vmatprep.subr.bf16.mxu1 %v466_v36 }
  0x61   :  { %437 = vmatpush3.bf16.msra.mxu0 %v434_v35 }
  0x62   :  { %469 = vmatpush3.bf16.msra.mxu1 %v466_v36  ;;  %439 = vmatprep.subr.bf16.mxu0 %v438_v41 }
  0x63   :  { %471 = vmatprep.subr.bf16.mxu1 %v470_v42 }
  0x65   :  { %441 = vmatpush3.bf16.msra.mxu0 %v438_v41 }
  0x66   :  { %473 = vmatpush3.bf16.msra.mxu1 %v470_v42  ;;  %443 = vmatprep.subr.bf16.mxu0 %v442_v47 }
  0x67   :  { %475 = vmatprep.subr.bf16.mxu1 %v474_v48 }
  0x69   :  { %445 = vmatpush3.bf16.msra.mxu0 %v442_v47 }
  0x6a   :  { %477 = vmatpush3.bf16.msra.mxu1 %v474_v48 }
  0x6c   :  { %377 = vmatmul.mubr.f32.vlgmr.msra.gmra.mrb[0].mxu0 %v80_v49 }
  0x6d   :  { %412 = vmatmul.mubr.f32.vlgmr.msra.gmra.mrb[0].mxu1 %v80_v49 }
 0x13f   :  { %v378_v52 = vpop.f32.mrb[0].mxu0 }
 0x140   :  { %v176_v54 = vadd.f32 %v378_v52, %v306_v50  ;;  %v170_v55 = vpop.f32.mrb[1].mxu0  ;;  %v413_v57 = vpop.f32.mrb[0].mxu1 }
 0x141   :  { %v171_v58 = vadd.f32 %v306_v50, %v170_v55  ;;  %v274_v59 = vadd.f32 %v413_v57, %v307_v51  ;;  %v268_v60 = vpop.f32.mrb[1].mxu1 }
 0x142   :  { %v280_v61 = vmul.f32 %v278_v53, %v176_v54  ;;  %v269_v62 = vadd.f32 %v307_v51, %v268_v60 }
 0x143   :  { %v279_v63 = vmul.f32 %v277_v56, %v171_v58 }
 0x144   :  { %v282_v0 = vadd.f32 %v280_v61, %v274_v59 }
 0x145   :  { %v281_v1 = vadd.f32 %v279_v63, %v269_v62 }
 0x146   :  { %485 = vtanh.f32 %v282_v0 }
 0x147   :  { %487 = vtanh.f32 %v281_v1 }
 0x150   :  { %v486_v2 = vpop.eup %485 }
 0x151   :  { %v488_v3 = vpop.eup %487  ;;  %286 = vst [vmem:[#allocation10 + $0x8] sm:$0xff] %v486_v2 }
 0x152   :  { %285 = vst [vmem:[#allocation10] sm:$0xff] %v488_v3 }
 0x153   :  { %588 = shalt.err (!%p585_p8)
}
 0x154   :  { %s589_s28 = scalar_lea.hbm %s750_s6, 256 }
 0x155   :  { %p590_p9 = scmp.ne.s32.totalorder %s750_s6, %s589_s28  ;;  %p593_p10 = scmp.lt.u32.totalorder %s589_s28, %s750_s6 }
 0x157   :  { %p595_p11 = pnand %p593_p10, %p590_p9 }
 0x159   :  { %598 = shalt.err (!%p595_p11)
}
 0x15a   :  { %298 = dma.vmem_to_hbm [thread:$0]  %s293_s25, 256, %s750_s6, [#allocation4], %s609_s9, %s609_s9, %s610_s10  }
 0x15b   :  { %605 = dma.done.wait [#allocation4], 256  }
 0x15c   :  { %606 = vsyncadd [#allocation4], 4294967040 }
 0x15d   :  { %302 = vsyncpa [#allocation3], 1 }
 0x15e   :  { %303 = vsyncpa [#allocation6], 1 }
 0x15f   :  { %304 = vsyncpa [#allocation9], 1 }
 0x160   :  { %305 = vsyncpa [#allocation4], 1 }

</bundles_post_ra>
